<compile_context>
chip_gen: v7x
topology: tpu7x:2x2x1
jax: 0.10.0
libtpu: 0.0.40
codegen_flags: <defaults>
</compile_context>

<pallas_src>
import jax
import jax.numpy as jnp
from jax.experimental import pallas as pl
from jax.experimental.pallas import tpu as pltpu

_LANES = 128                                # vreg lane width (fast axis)
_TILE_BUDGET_BYTES = 12 * 1024 * 1024       # sum of one (a, b, out) block set
_VMEM_LIMIT_DEFAULT = 32 * 1024 * 1024      # safe on v5e/v6e/v7x


def _add_kernel(a_ref, b_ref, o_ref):
    # Whole-tile elementwise add; any dtype promotion/cast happens on the VPU
    # (free slots for a mem-bound kernel), lane-dense unmasked store.
    o_ref[...] = (a_ref[...] + b_ref[...]).astype(o_ref.dtype)


def _round_up(x, m):
    return ((x + m - 1) // m) * m


def _sublane_granule(*dtypes):
    """Native packed sublane tile height for the narrowest dtype involved."""
    g = 8
    for dt in dtypes:
        g = max(g, 32 // max(1, jnp.dtype(dt).itemsize))
    return g


def _is_dual_core_chip():
    """True on chips with 2 TensorCores sharing the grid (v7x)."""
    try:
        kind = jax.devices()[0].device_kind.lower()
    except Exception:
        return False
    return "v7" in kind


def _vmem_limit_bytes():
    limit = _VMEM_LIMIT_DEFAULT
    try:
        cap = pltpu.get_tpu_info().vmem_capacity_bytes
        limit = min(limit, int(cap) * 3 // 4)   # never claim most of physical VMEM
    except Exception:
        pass
    return limit


def _choose_tile_rows(rows, granule, bytes_per_row, dual_core):
    """Row-tile: as large as the VMEM budget allows; single step on 1-TC chips
    when everything fits one block; even >=2-step split on dual-TC chips."""
    max_rows = max(granule, (_TILE_BUDGET_BYTES // bytes_per_row) // granule * granule)
    if rows <= granule:
        return rows                       # full-array block (always legal)
    if not dual_core:
        if rows <= max_rows:
            return rows                   # single grid step — no extra overhead
        return max_rows                   # last block partial -> Pallas masks it
    # dual-TC (v7x): aim for an even number of "parallel" steps, >= 2
    steps = max(2, pl.cdiv(rows, max_rows))
    if steps % 2:
        steps += 1
    return max(granule, _round_up(pl.cdiv(rows, steps), granule))


def _add_rows_pallas(a2, b2, out_dtype, tile_rows):
    rows = a2.shape[0]
    grid = (pl.cdiv(rows, tile_rows),)
    return pl.pallas_call(
        _add_kernel,
        out_shape=jax.ShapeDtypeStruct((rows, _LANES), out_dtype),
        grid_spec=pltpu.PrefetchScalarGridSpec(
            num_scalar_prefetch=0,
            grid=grid,
            in_specs=[
                pl.BlockSpec((tile_rows, _LANES), lambda i: (i, 0)),
                pl.BlockSpec((tile_rows, _LANES), lambda i: (i, 0)),
            ],
            out_specs=pl.BlockSpec((tile_rows, _LANES), lambda i: (i, 0)),
        ),
        compiler_params=pltpu.CompilerParams(
            dimension_semantics=("parallel",),
            vmem_limit_bytes=_vmem_limit_bytes(),
        ),
    )(a2, b2)


@jax.jit
def shortcut_pallas(x0, x1):
    """Shortcut.forward([x0, x1]) == x0 + x1, computed by a Pallas TPU kernel."""
    assert x0.shape == x1.shape, (x0.shape, x1.shape)
    out_dtype = jnp.promote_types(x0.dtype, x1.dtype)

    a = x0.reshape(-1)          # native dtypes; flat reshape is layout-free
    b = x1.reshape(-1)
    total = a.size
    rows = total // _LANES
    rem = total - rows * _LANES

    if rows == 0:
        # tiny tensor (<128 elems): a kernel launch would be pure overhead
        return (a + b).astype(out_dtype).reshape(x0.shape)

    granule = _sublane_granule(x0.dtype, x1.dtype, out_dtype)
    bytes_per_row = _LANES * (
        jnp.dtype(x0.dtype).itemsize
        + jnp.dtype(x1.dtype).itemsize
        + jnp.dtype(out_dtype).itemsize
    )
    tile_rows = _choose_tile_rows(rows, granule, bytes_per_row, _is_dual_core_chip())

    main = rows * _LANES
    a2 = (a if rem == 0 else a[:main]).reshape(rows, _LANES)
    b2 = (b if rem == 0 else b[:main]).reshape(rows, _LANES)

    out = _add_rows_pallas(a2, b2, out_dtype, tile_rows).reshape(main)
    if rem:
        # <128-element tail: plain XLA add instead of padding whole tensors
        tail = (a[main:] + b[main:]).astype(out_dtype)
        out = jnp.concatenate([out, tail])
    return out.reshape(x0.shape)


if __name__ == "__main__":
    key = jax.random.PRNGKey(0)
    k0, k1 = jax.random.split(key)

    # Main check: shape consistent with the module (N=2, C=4, H=W=16), f32.
    shape = (2, 4, 16, 16)
    x0 = jax.random.normal(k0, shape, dtype=jnp.float32)
    x1 = jax.random.normal(k1, shape, dtype=jnp.float32)

    out = jax.block_until_ready(shortcut_pallas(x0, x1))
    ref = x0 + x1
    assert out.shape == shape, out.shape
    assert out.dtype == ref.dtype, out.dtype
    assert jnp.allclose(out, ref, atol=1e-6, rtol=1e-6), (
        float(jnp.max(jnp.abs(out - ref))))

    # Extra check: size not a multiple of 128 exercises the kernel + XLA-tail path.
    shape2 = (2, 3, 37)
    y0 = jax.random.normal(k0, shape2, dtype=jnp.float32)
    y1 = jax.random.normal(k1, shape2, dtype=jnp.float32)
    out2 = jax.block_until_ready(shortcut_pallas(y0, y1))
    assert jnp.allclose(out2, y0 + y1, atol=1e-6, rtol=1e-6)

    print("KERNEL_OK")
</pallas_src>

<mosaic_0001>
module attributes {stable_mosaic.version = 11 : i64} {
  func.func @_add_kernel(%arg0: i32, %arg1: memref<16x128xf32, #tpu.memory_space<vmem>>, %arg2: memref<16x128xf32, #tpu.memory_space<vmem>>, %arg3: memref<16x128xf32, #tpu.memory_space<vmem>>) attributes {dimension_semantics = [#tpu.dimension_semantics<parallel>], iteration_bounds = array<i64: 1>, scalar_prefetch = 0 : i64, scratch_operands = 0 : i64, tpu.core_type = #tpu.core_type<tc>, window_params = [{transform_indices = @transform_0, window_bounds = array<i64: 16, 128>}, {transform_indices = @transform_1, window_bounds = array<i64: 16, 128>}, {transform_indices = @transform_2, window_bounds = array<i64: 16, 128>}]} {
    %c0 = arith.constant 0 : index
    %c0_0 = arith.constant 0 : index
    %0 = vector.load %arg1[%c0, %c0_0] : memref<16x128xf32, #tpu.memory_space<vmem>>, vector<16x128xf32>
    %c0_1 = arith.constant 0 : index
    %c0_2 = arith.constant 0 : index
    %1 = vector.load %arg2[%c0_1, %c0_2] : memref<16x128xf32, #tpu.memory_space<vmem>>, vector<16x128xf32>
    %2 = arith.addf %0, %1 : vector<16x128xf32>
    %c0_3 = arith.constant 0 : index
    %c0_4 = arith.constant 0 : index
    %3 = vector.load %arg3[%c0_3, %c0_4] : memref<16x128xf32, #tpu.memory_space<vmem>>, vector<16x128xf32>
    tpu.vector_store %arg3[%c0_3, %c0_4], %2 {strides = array<i32>} : memref<16x128xf32, #tpu.memory_space<vmem>>, vector<16x128xf32>,
    return
  }
  func.func @transform_0(%arg0: i32) -> (i32, i32) {
    %c0_i32 = arith.constant 0 : i32
    %c0_i32_0 = arith.constant 0 : i32
    return %arg0, %c0_i32 : i32, i32
  }
  func.func @transform_1(%arg0: i32) -> (i32, i32) {
    %c0_i32 = arith.constant 0 : i32
    %c0_i32_0 = arith.constant 0 : i32
    return %arg0, %c0_i32 : i32, i32
  }
  func.func @transform_2(%arg0: i32) -> (i32, i32) {
    %c0_i32 = arith.constant 0 : i32
    %c0_i32_0 = arith.constant 0 : i32
    return %arg0, %c0_i32 : i32, i32
  }
}

</mosaic_0001>

<bundles_post_ra>
// kernel: shortcut_pallas.1
= control target key start
LH: loop header
LB: loop body
LE: loop exit
PB: predicated region body
PF: predicated region fallthrough
CT: control target
= control target key end

     0   :  { %s56_s0 = inlined_call_operand.vmem [shape: f32[16,128], index: 0, kind: input, shape index: {}]   ;;  %s57_s1 = inlined_call_operand.vmem [shape: f32[16,128], index: 1, kind: input, shape index: {}]   ;;  %s58_s2 = inlined_call_operand.vmem [shape: f32[16,128], index: 2, kind: output, shape index: {}]  }
   0x1   :  { %v11_v0 = vld [vmem:[%s56_s0] sm:$0xff]  ;;  %v12_v2 = vld [vmem:[%s56_s0 + $0x8] sm:$0xff] }
   0x2   :  { %v13_v1 = vld [vmem:[%s57_s1] sm:$0xff]  ;;  %v14_v4 = vld [vmem:[%s57_s1 + $0x8] sm:$0xff] }
   0x3   :  { %v15_v3 = vadd.f32 %v13_v1, %v11_v0  ;;  %v16_v5 = vadd.f32 %v14_v4, %v12_v2 }
   0x5   :  { %17 = vst [vmem:[%s58_s2] sm:$0xff] %v15_v3  ;;  %18 = vst [vmem:[%s58_s2 + $0x8] sm:$0xff] %v16_v5 }

</bundles_post_ra>
